<compile_context>
chip_gen: v5e
topology: v5e:2x2
jax: 0.10.0
libtpu: 0.0.40
codegen_flags: <defaults>
</compile_context>

<pallas_src>
import jax
import jax.numpy as jnp
from jax import lax
from jax.experimental import pallas as pl
from jax.experimental.pallas import tpu as pltpu

N_IN = 22          # affine1 input features
N_HID = 128        # affine1 output features
N_ACT = 4          # action_head outputs
HEAD_W = 8         # fused head width: [4 action logits | 1 value | 3 zero pad]
MAX_TILE = 1024    # batch-tile cap (safe for v5e's 16 MiB default scoped VMEM)
SMALL_BATCH_XLA = 128  # below this, plain XLA beats the pallas_call launch cost


def policy_kernel(x_ref, w1_ref, b1_ref, wh_ref, bh_ref, out_ref):
    # ---- affine1: Linear(22 -> 128) + ReLU (bf16 operands, f32 accumulate) ----
    x = x_ref[...].astype(jnp.bfloat16)                                   # [TB, 22]
    h = jnp.dot(x, w1_ref[...], preferred_element_type=jnp.float32) + b1_ref[...]
    h = jnp.maximum(h, 0.0)                                               # [TB, 128] f32

    # ---- fused action_head + value_head: one MXU pass -> [TB, 8] --------------
    head = jnp.dot(h.astype(jnp.bfloat16), wh_ref[...],
                   preferred_element_type=jnp.float32) + bh_ref[...]      # [TB, 8]

    # ---- softmax over lanes [0, N_ACT); lane N_ACT carries the state value ----
    col = lax.broadcasted_iota(jnp.int32, head.shape, 1)
    is_logit = col < N_ACT
    masked = jnp.where(is_logit, head, -1e30)      # Python float -> literal, no capture
    m = jnp.max(masked, axis=-1, keepdims=True)
    e = jnp.exp(masked - m)                        # dead lanes underflow to exactly 0
    denom = jnp.sum(e, axis=-1, keepdims=True)
    prob = e / denom                               # exact divide: probs sum to 1

    # lanes 0..3 = probabilities, lane 4 = value, lanes 5..7 = 0
    out_ref[...] = jnp.where(is_logit, prob, head)


def _round_up8(n):
    return max(8, ((n + 7) // 8) * 8)


def _pick_tile(batch):
    """Batch tile: big tiles to amortize ~0.35us/grid-step overhead, but split into
    >=2 steps for mid-size batches so v7x's two TensorCores both get work."""
    if batch > MAX_TILE:
        return MAX_TILE
    if batch > 256:
        return min(MAX_TILE, _round_up8(-(-batch // 2)))   # cdiv(batch, 2), /8-aligned
    return _round_up8(batch)


def _policy_forward_pallas(x, fused_params):
    w1, b1, wh, bh = fused_params
    B = x.shape[0]
    TB = _pick_tile(B)
    n_blk = pl.cdiv(B, TB)          # ragged tail handled by Pallas (no jnp.pad of x)

    # weights/biases: constant index_map -> stay resident in VMEM across grid steps
    const_spec = lambda arr: pl.BlockSpec(arr.shape, lambda i: (0, 0))

    out = pl.pallas_call(
        policy_kernel,
        out_shape=jax.ShapeDtypeStruct((B, HEAD_W), jnp.float32),
        grid=(n_blk,),
        in_specs=[
            pl.BlockSpec((TB, N_IN), lambda i: (i, 0)),   # x: tiled over batch
            const_spec(w1),
            const_spec(b1),
            const_spec(wh),
            const_spec(bh),
        ],
        out_specs=pl.BlockSpec((TB, HEAD_W), lambda i: (i, 0)),
        compiler_params=pltpu.CompilerParams(
            dimension_semantics=("parallel",)),           # shardable across TCs on v7x
    )(x, w1, b1, wh, bh)

    action_prob = out[:, :N_ACT]
    state_values = out[:, N_ACT:N_ACT + 1]
    return action_prob, state_values


def _policy_forward_xla(x, fused_params):
    """Plain-XLA path for tiny acting-time batches (same fused params / precision)."""
    w1, b1, wh, bh = fused_params
    h = jnp.maximum(
        jnp.dot(x.astype(jnp.bfloat16), w1, preferred_element_type=jnp.float32) + b1,
        0.0)
    head = jnp.dot(h.astype(jnp.bfloat16), wh,
                   preferred_element_type=jnp.float32) + bh
    action_prob = jax.nn.softmax(head[:, :N_ACT], axis=-1)
    state_values = head[:, N_ACT:N_ACT + 1]
    return action_prob, state_values


def policy_forward(x, fused_params, *, force_pallas=False):
    """x: [B, 22] float32. Returns (action_prob [B, 4], state_values [B, 1])."""
    B = x.shape[0]
    if (not force_pallas) and B <= SMALL_BATCH_XLA:
        return _policy_forward_xla(x, fused_params)
    return _policy_forward_pallas(x, fused_params)


def init_params(key):
    """PyTorch-style nn.Linear init. Weights stored transposed: W[in, out]."""
    k1, k2, k3, k4, k5, k6 = jax.random.split(key, 6)

    def uinit(k, shape, fan_in):
        bound = 1.0 / jnp.sqrt(jnp.float32(fan_in))
        return jax.random.uniform(k, shape, jnp.float32, -bound, bound)

    w1 = uinit(k1, (N_IN, N_HID), N_IN)     # affine1.weight.T
    b1 = uinit(k2, (1, N_HID), N_IN)        # affine1.bias
    wa = uinit(k3, (N_HID, N_ACT), N_HID)   # action_head.weight.T
    ba = uinit(k4, (1, N_ACT), N_HID)       # action_head.bias
    wv = uinit(k5, (N_HID, 1), N_HID)       # value_head.weight.T
    bv = uinit(k6, (1, 1), N_HID)           # value_head.bias
    return (w1, b1, wa, ba, wv, bv)


def fuse_params(params):
    """Fuse action/value heads into one [128, 8] weight (+ zero pad); cast matmul
    weights to bf16 (biases stay f32 for the f32 add path)."""
    w1, b1, wa, ba, wv, bv = params
    pad_w = jnp.zeros((N_HID, HEAD_W - N_ACT - 1), jnp.float32)
    pad_b = jnp.zeros((1, HEAD_W - N_ACT - 1), jnp.float32)
    wh = jnp.concatenate([wa, wv, pad_w], axis=1)   # [128, 8]
    bh = jnp.concatenate([ba, bv, pad_b], axis=1)   # [1, 8]
    return (w1.astype(jnp.bfloat16), b1, wh.astype(jnp.bfloat16), bh)


def _ref_forward(x, raw_params):
    """Reference with the same bf16-operand / f32-accumulate matmul precision."""
    w1, b1, wa, ba, wv, bv = raw_params
    h = jnp.maximum(
        jnp.dot(x.astype(jnp.bfloat16), w1.astype(jnp.bfloat16),
                preferred_element_type=jnp.float32) + b1, 0.0)
    logits = jnp.dot(h.astype(jnp.bfloat16), wa.astype(jnp.bfloat16),
                     preferred_element_type=jnp.float32) + ba
    prob = jax.nn.softmax(logits, axis=-1)
    val = jnp.dot(h.astype(jnp.bfloat16), wv.astype(jnp.bfloat16),
                  preferred_element_type=jnp.float32) + bv
    return prob, val


if __name__ == "__main__":
    key = jax.random.PRNGKey(0)
    kp, kx1, kx2 = jax.random.split(key, 3)
    raw_params = init_params(kp)
    fused_params = fuse_params(raw_params)

    fwd = jax.jit(policy_forward, static_argnames=("force_pallas",))

    # ---- tiny acting-time batch: force the Pallas path so the kernel runs ----
    B = 2
    x = jax.random.normal(kx1, (B, N_IN), jnp.float32)
    action_prob, state_values = fwd(x, fused_params, force_pallas=True)
    jax.block_until_ready((action_prob, state_values))

    prob_ref, val_ref = _ref_forward(x, raw_params)
    assert action_prob.shape == (B, N_ACT) and state_values.shape == (B, 1)
    assert jnp.allclose(action_prob, prob_ref, atol=2e-3, rtol=2e-3)
    assert jnp.allclose(state_values, val_ref, atol=2e-3, rtol=2e-3)
    assert jnp.allclose(jnp.sum(action_prob, axis=-1), 1.0, atol=1e-3)

    # ---- mid-size batch: auto-dispatch uses Pallas, 2 grid steps + ragged tail ----
    B2 = 300
    x2 = jax.random.normal(kx2, (B2, N_IN), jnp.float32)
    ap2, sv2 = fwd(x2, fused_params)
    jax.block_until_ready((ap2, sv2))
    pr2, vr2 = _ref_forward(x2, raw_params)
    assert ap2.shape == (B2, N_ACT) and sv2.shape == (B2, 1)
    assert jnp.allclose(ap2, pr2, atol=2e-3, rtol=2e-3)
    assert jnp.allclose(sv2, vr2, atol=2e-3, rtol=2e-3)
    assert jnp.allclose(jnp.sum(ap2, axis=-1), 1.0, atol=1e-3)

    print("KERNEL_OK")
</pallas_src>

<mosaic_0001>
module attributes {stable_mosaic.version = 11 : i64} {
  func.func @policy_kernel(%arg0: i32, %arg1: memref<8x22xf32, #tpu.memory_space<vmem>>, %arg2: memref<22x128xbf16, #tpu.memory_space<vmem>>, %arg3: memref<1x128xf32, #tpu.memory_space<vmem>>, %arg4: memref<128x8xbf16, #tpu.memory_space<vmem>>, %arg5: memref<1x8xf32, #tpu.memory_space<vmem>>, %arg6: memref<8x8xf32, #tpu.memory_space<vmem>>) attributes {dimension_semantics = [#tpu.dimension_semantics<parallel>], iteration_bounds = array<i64: 1>, scalar_prefetch = 0 : i64, scratch_operands = 0 : i64, tpu.core_type = #tpu.core_type<tc>, window_params = [{transform_indices = @transform_0, window_bounds = array<i64: 8, 22>}, {pipeline_mode = #tpu.pipeline_mode<synchronous>, transform_indices = @transform_1, window_bounds = array<i64: 22, 128>}, {pipeline_mode = #tpu.pipeline_mode<synchronous>, transform_indices = @transform_2, window_bounds = array<i64: 1, 128>}, {pipeline_mode = #tpu.pipeline_mode<synchronous>, transform_indices = @transform_3, window_bounds = array<i64: 128, 8>}, {pipeline_mode = #tpu.pipeline_mode<synchronous>, transform_indices = @transform_4, window_bounds = array<i64: 1, 8>}, {transform_indices = @transform_5, window_bounds = array<i64: 8, 8>}]} {
    %c0 = arith.constant 0 : index
    %c0_0 = arith.constant 0 : index
    %0 = vector.load %arg1[%c0, %c0_0] : memref<8x22xf32, #tpu.memory_space<vmem>>, vector<8x22xf32>
    %1 = arith.truncf %0 : vector<8x22xf32> to vector<8x22xbf16>
    %c0_1 = arith.constant 0 : index
    %c0_2 = arith.constant 0 : index
    %2 = vector.load %arg2[%c0_1, %c0_2] : memref<22x128xbf16, #tpu.memory_space<vmem>>, vector<22x128xbf16>
    %cst = arith.constant dense<0.000000e+00> : vector<8x128xf32>
    %3 = tpu.matmul %1, %2, %cst {dimension_numbers = #tpu.dot_dimension_numbers<[1], [0], [0], [1], [0, 0, 1, 1], [], []>} : vector<8x22xbf16>, vector<22x128xbf16>, vector<8x128xf32> -> vector<8x128xf32>
    %c0_3 = arith.constant 0 : index
    %c0_4 = arith.constant 0 : index
    %4 = vector.load %arg3[%c0_3, %c0_4] : memref<1x128xf32, #tpu.memory_space<vmem>>, vector<1x128xf32>
    %5 = vector.broadcast %4 : vector<1x128xf32> to vector<8x128xf32>
    %6 = arith.addf %3, %5 : vector<8x128xf32>
    %cst_5 = arith.constant 0.000000e+00 : f32
    %7 = vector.broadcast %cst_5 : f32 to vector<8x128xf32>
    %8 = arith.maximumf %6, %7 : vector<8x128xf32>
    %9 = arith.truncf %8 : vector<8x128xf32> to vector<8x128xbf16>
    %c0_6 = arith.constant 0 : index
    %c0_7 = arith.constant 0 : index
    %10 = vector.load %arg4[%c0_6, %c0_7] : memref<128x8xbf16, #tpu.memory_space<vmem>>, vector<128x8xbf16>
    %cst_8 = arith.constant dense<0.000000e+00> : vector<8x8xf32>
    %11 = tpu.matmul %9, %10, %cst_8 {dimension_numbers = #tpu.dot_dimension_numbers<[1], [0], [0], [1], [0, 0, 1, 1], [], []>} : vector<8x128xbf16>, vector<128x8xbf16>, vector<8x8xf32> -> vector<8x8xf32>
    %c0_9 = arith.constant 0 : index
    %c0_10 = arith.constant 0 : index
    %12 = vector.load %arg5[%c0_9, %c0_10] : memref<1x8xf32, #tpu.memory_space<vmem>>, vector<1x8xf32>
    %13 = vector.broadcast %12 : vector<1x8xf32> to vector<8x8xf32>
    %14 = arith.addf %11, %13 : vector<8x8xf32>
    %15 = tpu.iota {dimensions = array<i32: 1>} : vector<8x8xi32>
    %c4_i32 = arith.constant 4 : i32
    %16 = vector.broadcast %c4_i32 : i32 to vector<8x8xi32>
    %17 = arith.cmpi slt, %15, %16 : vector<8x8xi32>
    %cst_11 = arith.constant -1.000000e+30 : f32
    %18 = vector.broadcast %cst_11 : f32 to vector<8x8xf32>
    %19 = arith.select %17, %14, %18 : vector<8x8xi1>, vector<8x8xf32>
    %cst_12 = arith.constant dense<0xFF800000> : vector<8xf32>
    %20 = vector.multi_reduction <maximumf>, %19, %cst_12 [1] : vector<8x8xf32> to vector<8xf32>
    %21 = vector.shape_cast %20 : vector<8xf32> to vector<8x1xf32>
    %22 = vector.broadcast %21 : vector<8x1xf32> to vector<8x8xf32>
    %23 = arith.subf %19, %22 : vector<8x8xf32>
    %24 = math.exp %23 : vector<8x8xf32>
    %cst_13 = arith.constant dense<0.000000e+00> : vector<8xf32>
    %25 = vector.multi_reduction <add>, %24, %cst_13 [1] : vector<8x8xf32> to vector<8xf32>
    %26 = vector.shape_cast %25 : vector<8xf32> to vector<8x1xf32>
    %27 = vector.broadcast %26 : vector<8x1xf32> to vector<8x8xf32>
    %28 = arith.divf %24, %27 : vector<8x8xf32>
    %29 = arith.select %17, %28, %14 : vector<8x8xi1>, vector<8x8xf32>
    %c0_14 = arith.constant 0 : index
    %c0_15 = arith.constant 0 : index
    %30 = vector.load %arg6[%c0_14, %c0_15] : memref<8x8xf32, #tpu.memory_space<vmem>>, vector<8x8xf32>
    tpu.vector_store %arg6[%c0_14, %c0_15], %29 {strides = array<i32>} : memref<8x8xf32, #tpu.memory_space<vmem>>, vector<8x8xf32>,
    return
  }
  func.func @transform_0(%arg0: i32) -> (i32, i32) {
    %c0_i32 = arith.constant 0 : i32
    %c0_i32_0 = arith.constant 0 : i32
    return %arg0, %c0_i32 : i32, i32
  }
  func.func @transform_1(%arg0: i32) -> (i32, i32) {
    %c0_i32 = arith.constant 0 : i32
    %c0_i32_0 = arith.constant 0 : i32
    %c0_i32_1 = arith.constant 0 : i32
    return %c0_i32, %c0_i32_0 : i32, i32
  }
  func.func @transform_2(%arg0: i32) -> (i32, i32) {
    %c0_i32 = arith.constant 0 : i32
    %c0_i32_0 = arith.constant 0 : i32
    %c0_i32_1 = arith.constant 0 : i32
    return %c0_i32, %c0_i32_0 : i32, i32
  }
  func.func @transform_3(%arg0: i32) -> (i32, i32) {
    %c0_i32 = arith.constant 0 : i32
    %c0_i32_0 = arith.constant 0 : i32
    %c0_i32_1 = arith.constant 0 : i32
    return %c0_i32, %c0_i32_0 : i32, i32
  }
  func.func @transform_4(%arg0: i32) -> (i32, i32) {
    %c0_i32 = arith.constant 0 : i32
    %c0_i32_0 = arith.constant 0 : i32
    %c0_i32_1 = arith.constant 0 : i32
    return %c0_i32, %c0_i32_0 : i32, i32
  }
  func.func @transform_5(%arg0: i32) -> (i32, i32) {
    %c0_i32 = arith.constant 0 : i32
    %c0_i32_0 = arith.constant 0 : i32
    return %arg0, %c0_i32 : i32, i32
  }
}

</mosaic_0001>

<bundles_post_ra>
// kernel: policy_forward.1
= control target key start
LH: loop header
LB: loop body
LE: loop exit
PB: predicated region body
PF: predicated region fallthrough
CT: control target
= control target key end

     0   :  { %vm43_vm0 = vcmask 1042432   ;;  %vm39_vm1 = vcmask 179200   ;;  %v143_v21 = vlaneseq  ;;  %vm147_vm3 = vcmask 64512   ;;  %s344_s0 = inlined_call_operand.vmem [shape: f32[2,22], index: 0, kind: input, shape index: {}]   ;;  %s345_s1 = inlined_call_operand.vmem [shape: bf16[22,128], index: 1, kind: input, shape index: {}]   ;;  %s346_s2 = inlined_call_operand.vmem [shape: f32[1,128], index: 2, kind: input, shape index: {}]   ;;  %s347_s3 = inlined_call_operand.vmem [shape: bf16[128,8], index: 3, kind: input, shape index: {}]   ;;  %s348_s4 = inlined_call_operand.vmem [shape: f32[1,8], index: 4, kind: input, shape index: {}]   ;;  %s349_s5 = inlined_call_operand.vmem [shape: f32[2,8], index: 5, kind: output, shape index: {}]  }
   0x1   :  { %v25_v0 = vld [vmem:[%s345_s1 + $0x8] sm:$0x7]  ;;  %v260_v2 = vld [vmem:[%s347_s3 + $0x38] sm:$0xff]  ;;  %v259_v4 = vld [vmem:[%s347_s3 + $0x30] sm:$0xff] }
   0x2   :  { %v35_v1 = vunpack.c.l.b16 %v25_v0  ;;  %130 = vmatpush.bf16.msra.mxu1 %v260_v2  ;;  %v252_v6 = vld [vmem:[%s345_s1] sm:$0xff]  ;;  %v258_v8 = vld [vmem:[%s347_s3 + $0x28] sm:$0xff]  ;;  %v256_v11 = vld [vmem:[%s347_s3 + $0x18] sm:$0xff]  ;;  %v144_v22 = vand.u32 127, %v143_v21 }
   0x3   :  { %v21_v7 = vld [vmem:[%s344_s0] sm:$0xff]  ;;  %v255_v12 = vld [vmem:[%s347_s3 + $0x10] sm:$0xff]  ;;  %v254_v13 = vld [vmem:[%s347_s3 + $0x8] sm:$0xff] }
   0x4   :  { %v37_v3 = vpack.c.b16 %v35_v1, %v35_v1  ;;  %v22_v9 = vpack.c.bf16 %v21_v7, %v21_v7  ;;  %v257_v10 = vld [vmem:[%s347_s3 + $0x20] sm:$0xff]  ;;  %vm145_vm2 = vcmp.lt.s32.totalorder %v144_v22, 4 }
   0x5   :  { %v253_v14 = vld [vmem:[%s347_s3] sm:$0xff] }
   0x6   :  { %v45_v5 = vsel %vm43_vm0, %v37_v3, 0  ;;  %131 = vmatpush.bf16.msra.mxu1 %v259_v4  ;;  %v261_v15 = vld [vmem:[%s346_s2] ss:$0 sm:$0xff] }
   0x7   :  { %53 = vmatpush.bf16.msra.mxu0 %v45_v5  ;;  %v262_v23 = vld [vmem:[%s348_s4] ss:$0 sm:$0xff] }
   0xa   :  { %132 = vmatpush.bf16.msra.mxu1 %v258_v8 }
   0xb   :  { %54 = vmatpush.bf16.msra.mxu0 %v252_v6 }
   0xe   :  { %219 = vmatmul.msk.bf16.vlgmr.msra.gmra.mxu0 %vm39_vm1, %v22_v9  ;;  %133 = vmatpush.bf16.msra.mxu1 %v257_v10 }
  0x12   :  { %134 = vmatpush.bf16.msra.mxu1 %v256_v11 }
  0x16   :  { %135 = vmatpush.bf16.msra.mxu1 %v255_v12 }
  0x1a   :  { %136 = vmatpush.bf16.msra.mxu1 %v254_v13 }
  0x1e   :  { %137 = vmatpush.bf16.msra.mxu1 %v253_v14 }
  0x8b   :  { %v56_v16 = vpop.f32.mrf.mxu0 }
  0x8c   :  { %v57_v17 = vadd.f32 %v261_v15, %v56_v16 }
  0x8e   :  { %v60_v18 = vmax.f32 %v57_v17, 0.0 }
  0x90   :  { %v61_v19 = vpack.c.bf16 %v60_v18, %v60_v18 }
  0x92   :  { %138 = vmatmul.bf16.vlgmr.msra.gmra.mxu1 %v61_v19 }
  0x93   :  { %v58_v20 = vpop.f32.mrf.mxu0 }
 0x10f   :  { %v139_v24 = vpop.f32.mrf.mxu1 }
 0x110   :  { %v140_v25 = vadd.f32 %v262_v23, %v139_v24 }
 0x112   :  { %v146_v26 = vsel %vm145_vm2, %v140_v25, -1e+30 }
 0x113   :  { %v148_v27 = vsel %vm147_vm3, %v146_v26, -inf }
 0x114   :  { %149 = vmax.xlane.f32.xlu0 %v148_v27 }
 0x117   :  { %v141_v28 = vpop.f32.mrf.mxu1 }
 0x187   :  { %v150_v29 = vpop.xlane.xlu0 %149 }
 0x188   :  { %v151_v30 = vsub.f32 %v146_v26, %v150_v29 }
 0x18a   :  { %v152_v31 = vmul.f32 1.442695, %v151_v30 }
 0x18c   :  { %263 = vpow2.f32 %v152_v31 }
 0x192   :  { %v264_v32 = vpop.eup %263 }
 0x193   :  { %v154_v33 = vsel %vm147_vm3, %v264_v32, 0.0 }
 0x194   :  { %155 = vadd.xlane.f32.xlu0 %v154_v33 }
 0x207   :  { %v156_v34 = vpop.xlane.xlu0 %155 }
 0x208   :  { %265 = vrcp.f32 %v156_v34  ;;  %v168_v38 = vand.u32 2147483648, %v156_v34  ;;  %v166_v40 = vand.u32 2147483647, %v156_v34  ;;  %vm162_vm5 = vweird.f32 %v156_v34 }
 0x20a   :  { %v169_v42 = vor.u32 1.1754944e-38, %v168_v38  ;;  %vm167_vm7 = vcmp.eq.f32.partialorder %v166_v40, 8.507059e+37 }
 0x20e   :  { %v266_v35 = vpop.eup %265 }
 0x20f   :  { %v158_v36 = vmul.f32 %v266_v35, %v156_v34  ;;  %vm163_vm4 = vweird.f32 %v266_v35 }
 0x210   :  { %vm164_vm6 = vmor %vm162_vm5, %vm163_vm4 }
 0x211   :  { %v159_v37 = vsub.f32 1.0, %v158_v36 }
 0x213   :  { %v160_v39 = vmul.f32 %v266_v35, %v159_v37 }
 0x215   :  { %v161_v41 = vadd.f32 %v266_v35, %v160_v39 }
 0x217   :  { %v165_v43 = vsel %vm164_vm6, %v266_v35, %v161_v41 }
 0x218   :  { %v170_v44 = vsel %vm167_vm7, %v169_v42, %v165_v43 }
 0x219   :  { %v171_v45 = vmul.f32 %v264_v32, %v170_v44 }
 0x21b   :  { %v172_v46 = vsel %vm145_vm2, %v171_v45, %v140_v25 }
 0x21c   :  { %173 = vst.msk [vmem:[#allocation2] sm:$0xff] %vm147_vm3, %v172_v46 }
 0x223   :  { %v192_v47 = vld [vmem:[#allocation2] sm:$0x3] }
 0x224   :  { %193 = vst [vmem:[%s349_s5] sm:$0x3] %v192_v47 }

</bundles_post_ra>
